<compile_context>
chip_gen: v5e
topology: v5e:2x2
jax: 0.10.0
libtpu: 0.0.40
codegen_flags: <defaults>
</compile_context>

<pallas_src>
import jax
import jax.numpy as jnp
from jax.experimental import pallas as pl
from jax.experimental.pallas import tpu as pltpu


# --------------------------------------------------------------------------- kernels
def _lap_stencil(x_ref, halo_ref, o_ref):
    """3x3 Laplacian 'valid' stencil on one block.

    x_ref:    (BN, RI, W)   input rows (RI = H in whole-image mode, TH in tiled mode)
    halo_ref: (BN, 8*, W)   next rows of the same image (row-tiled mode), or None
    o_ref:    (BN, RO, W-2) valid output rows; out[r, c] uses input rows r, r+1, r+2
                            and columns c, c+1, c+2.
    """
    _, ri, w = x_ref.shape
    ro = o_ref.shape[1]
    x = x_ref[...].astype(jnp.float32)

    def row_lap(top, mid, bot):
        # top/mid/bot: (BN, k, W) -> (BN, k, W-2)
        return (top[:, :, 1:w - 1] + bot[:, :, 1:w - 1]
                + mid[:, :, 0:w - 2] + mid[:, :, 2:w]
                - 4.0 * mid[:, :, 1:w - 1])

    # Rows computable from the main block alone (all of them in whole-image mode).
    nmain = min(ro, ri - 2)
    if nmain > 0:
        o_ref[:, 0:nmain, :] = row_lap(
            x[:, 0:nmain, :], x[:, 1:nmain + 1, :], x[:, 2:nmain + 2, :]
        ).astype(o_ref.dtype)

    # Tail rows needing the 2-row lookahead halo (row-tiled mode only; static trip count).
    for r in range(nmain, ro):
        def row(i):
            if i < ri:
                return x[:, i:i + 1, :]
            return halo_ref[:, i - ri:i - ri + 1, :].astype(jnp.float32)

        o_ref[:, r:r + 1, :] = row_lap(row(r), row(r + 1), row(r + 2)).astype(o_ref.dtype)


def _lap_kernel_whole(x_ref, o_ref):
    _lap_stencil(x_ref, None, o_ref)


def _lap_kernel_tiled(x_ref, halo_ref, o_ref):
    _lap_stencil(x_ref, halo_ref, o_ref)


# --------------------------------------------------------------------------- tiling
def _pick_tiles(n, h, w, itemsize, target_bytes):
    """Returns (block_images, block_rows).  block_rows is None => whole-image mode."""
    sub = 8 * max(1, 4 // itemsize)              # sublane multiple for this dtype
    row_bytes = max(1, w * itemsize)
    rows_budget = max(sub, target_bytes // row_bytes)

    if h <= rows_budget:                          # whole image(s) fit in one block
        bn = max(1, min(n, rows_budget // h))
        return bn, None

    # Row-tiled mode: one image per block, TH rows of output per grid step.
    th = max(sub, (min(rows_budget, h - 2) // sub) * sub)
    out_rows = h - 2
    cand = th
    while cand >= max(sub, th // 2):              # prefer TH dividing H-2 (no ragged tile)
        if out_rows % cand == 0:
            th = cand
            break
        cand -= sub
    return 1, th


# --------------------------------------------------------------------------- wrapper
def lap_filter(x, *, block_rows=None, block_images=None, target_block_bytes=2 << 20):
    """x: (N, C, H, W) with C == 1 (or 3 -> grayscale). Returns (N, 1, H-2, W-2)."""
    N, C, H, W = x.shape
    if C == 3:
        # torchvision rgb_to_grayscale weights, done as a plain-JAX op in the wrapper.
        gw = jnp.array([0.2989, 0.587, 0.114], dtype=x.dtype)
        x = jnp.einsum("nchw,c->nhw", x, gw)[:, None]
        C = 1
    assert C == 1, "lap_filter expects 1 (or 3) input channels"
    assert H >= 3 and W >= 3, "valid 3x3 conv needs H, W >= 3"

    out_dtype = x.dtype
    xs = x.reshape(N, H, W)
    itemsize = xs.dtype.itemsize
    sub = 8 * max(1, 4 // itemsize)

    if block_rows is not None:
        assert block_rows % sub == 0 and block_rows >= sub
        bn, th = 1, int(block_rows)
    elif block_images is not None:
        bn, th = max(1, min(int(block_images), N)), None
    else:
        bn, th = _pick_tiles(N, H, W, itemsize, target_block_bytes)

    cp = pltpu.CompilerParams(
        dimension_semantics=("parallel",) if th is None else ("parallel", "parallel"),
        vmem_limit_bytes=48 * 1024 * 1024,
    )

    if th is None:
        # Whole-image mode: BN images per block, no halo needed.
        grid = (pl.cdiv(N, bn),)
        z = pl.pallas_call(
            _lap_kernel_whole,
            out_shape=jax.ShapeDtypeStruct((N, H - 2, W - 2), out_dtype),
            grid=grid,
            in_specs=[pl.BlockSpec((bn, H, W), lambda b: (b, 0, 0))],
            out_specs=pl.BlockSpec((bn, H - 2, W - 2), lambda b: (b, 0, 0)),
            compiler_params=cp,
        )(xs)
    else:
        # Row-tiled mode: one image per block, TH output rows per step, plus a small
        # lookahead halo block (next `sub` input rows, clamped in-bounds; when clamping
        # kicks in the halo only feeds discarded out-of-range output rows).
        tb = th // sub
        halo_last = pl.cdiv(H, sub) - 1
        grid = (N, pl.cdiv(H - 2, th))
        z = pl.pallas_call(
            _lap_kernel_tiled,
            out_shape=jax.ShapeDtypeStruct((N, H - 2, W - 2), out_dtype),
            grid=grid,
            in_specs=[
                pl.BlockSpec((1, th, W), lambda b, t: (b, t, 0)),
                pl.BlockSpec(
                    (1, sub, W),
                    lambda b, t: (b, jnp.minimum((t + 1) * tb, halo_last), 0),
                ),
            ],
            out_specs=pl.BlockSpec((1, th, W - 2), lambda b, t: (b, t, 0)),
            compiler_params=cp,
        )(xs, xs)

    return z.reshape(N, 1, H - 2, W - 2)


# --------------------------------------------------------------------------- reference
def _reference(x):
    if x.shape[1] == 3:
        gw = jnp.array([0.2989, 0.587, 0.114], dtype=x.dtype)
        x = jnp.einsum("nchw,c->nhw", x, gw)[:, None]
    w = jnp.array(
        [[0.0, 1.0, 0.0], [1.0, -4.0, 1.0], [0.0, 1.0, 0.0]], dtype=jnp.float32
    ).reshape(1, 1, 3, 3)  # OIHW
    return jax.lax.conv_general_dilated(
        x.astype(jnp.float32), w, window_strides=(1, 1), padding="VALID",
        dimension_numbers=("NCHW", "OIHW", "NCHW"),
    ).astype(x.dtype)


if __name__ == "__main__":
    key = jax.random.PRNGKey(0)
    k1, k2, k3 = jax.random.split(key, 3)

    # Primary test: module's default single-channel path (whole-image mode, BN folding).
    x = jax.random.normal(k1, (2, 1, 16, 16), dtype=jnp.float32)
    out = jax.block_until_ready(lap_filter(x))
    assert out.shape == (2, 1, 14, 14), out.shape
    assert jnp.allclose(out, _reference(x), atol=1e-5, rtol=1e-5), "mismatch (primary)"

    # Row-tiled mode: multiple row tiles, halo lookahead, ragged last row tile.
    x2 = jax.random.normal(k2, (1, 1, 70, 200), dtype=jnp.float32)
    out2 = jax.block_until_ready(lap_filter(x2, block_rows=16))
    assert out2.shape == (1, 1, 68, 198), out2.shape
    assert jnp.allclose(out2, _reference(x2), atol=1e-4, rtol=1e-4), "mismatch (tiled)"

    # Whole-image mode with a partial batch block (N not divisible by block_images).
    x3 = jax.random.normal(k3, (3, 1, 16, 16), dtype=jnp.float32)
    out3 = jax.block_until_ready(lap_filter(x3, block_images=2))
    assert out3.shape == (3, 1, 14, 14), out3.shape
    assert jnp.allclose(out3, _reference(x3), atol=1e-5, rtol=1e-5), "mismatch (batch)"

    print("KERNEL_OK")
</pallas_src>

<mosaic_0001>
module attributes {stable_mosaic.version = 11 : i64} {
  func.func @_lap_kernel_whole(%arg0: i32, %arg1: memref<2x16x16xf32, #tpu.memory_space<vmem>>, %arg2: memref<2x14x14xf32, #tpu.memory_space<vmem>>) attributes {dimension_semantics = [#tpu.dimension_semantics<parallel>], iteration_bounds = array<i64: 1>, scalar_prefetch = 0 : i64, scratch_operands = 0 : i64, tpu.core_type = #tpu.core_type<tc>, window_params = [{transform_indices = @transform_0, window_bounds = array<i64: 2, 16, 16>}, {transform_indices = @transform_1, window_bounds = array<i64: 2, 14, 14>}]} {
    %c0 = arith.constant 0 : index
    %c0_0 = arith.constant 0 : index
    %c0_1 = arith.constant 0 : index
    %0 = vector.load %arg1[%c0, %c0_0, %c0_1] : memref<2x16x16xf32, #tpu.memory_space<vmem>>, vector<2x16x16xf32>
    %1 = vector.extract_strided_slice %0 {offsets = [0, 0, 0], sizes = [2, 14, 16], strides = [1, 1, 1]} : vector<2x16x16xf32> to vector<2x14x16xf32>
    %2 = vector.extract_strided_slice %0 {offsets = [0, 1, 0], sizes = [2, 14, 16], strides = [1, 1, 1]} : vector<2x16x16xf32> to vector<2x14x16xf32>
    %3 = vector.extract_strided_slice %0 {offsets = [0, 2, 0], sizes = [2, 14, 16], strides = [1, 1, 1]} : vector<2x16x16xf32> to vector<2x14x16xf32>
    %4 = vector.extract_strided_slice %1 {offsets = [0, 0, 1], sizes = [2, 14, 14], strides = [1, 1, 1]} : vector<2x14x16xf32> to vector<2x14x14xf32>
    %5 = vector.extract_strided_slice %3 {offsets = [0, 0, 1], sizes = [2, 14, 14], strides = [1, 1, 1]} : vector<2x14x16xf32> to vector<2x14x14xf32>
    %6 = arith.addf %4, %5 : vector<2x14x14xf32>
    %7 = vector.extract_strided_slice %2 {offsets = [0, 0, 0], sizes = [2, 14, 14], strides = [1, 1, 1]} : vector<2x14x16xf32> to vector<2x14x14xf32>
    %8 = arith.addf %6, %7 : vector<2x14x14xf32>
    %9 = vector.extract_strided_slice %2 {offsets = [0, 0, 2], sizes = [2, 14, 14], strides = [1, 1, 1]} : vector<2x14x16xf32> to vector<2x14x14xf32>
    %10 = arith.addf %8, %9 : vector<2x14x14xf32>
    %11 = vector.extract_strided_slice %2 {offsets = [0, 0, 1], sizes = [2, 14, 14], strides = [1, 1, 1]} : vector<2x14x16xf32> to vector<2x14x14xf32>
    %cst = arith.constant 4.000000e+00 : f32
    %12 = vector.broadcast %cst : f32 to vector<2x14x14xf32>
    %13 = arith.mulf %12, %11 : vector<2x14x14xf32>
    %14 = arith.subf %10, %13 : vector<2x14x14xf32>
    %c0_2 = arith.constant 0 : index
    %c0_3 = arith.constant 0 : index
    %c0_4 = arith.constant 0 : index
    %15 = vector.load %arg2[%c0_2, %c0_3, %c0_4] : memref<2x14x14xf32, #tpu.memory_space<vmem>>, vector<2x14x14xf32>
    tpu.vector_store %arg2[%c0_2, %c0_3, %c0_4], %14 {strides = array<i32>} : memref<2x14x14xf32, #tpu.memory_space<vmem>>, vector<2x14x14xf32>,
    return
  }
  func.func @transform_0(%arg0: i32) -> (i32, i32, i32) {
    %c0_i32 = arith.constant 0 : i32
    %c0_i32_0 = arith.constant 0 : i32
    %c0_i32_1 = arith.constant 0 : i32
    return %arg0, %c0_i32, %c0_i32_0 : i32, i32, i32
  }
  func.func @transform_1(%arg0: i32) -> (i32, i32, i32) {
    %c0_i32 = arith.constant 0 : i32
    %c0_i32_0 = arith.constant 0 : i32
    %c0_i32_1 = arith.constant 0 : i32
    return %arg0, %c0_i32, %c0_i32_0 : i32, i32, i32
  }
}

</mosaic_0001>

<bundles_post_ra>
// kernel: tpu_custom_call.1
= control target key start
LH: loop header
LB: loop body
LE: loop exit
PB: predicated region body
PF: predicated region fallthrough
CT: control target
= control target key end

     0   :  { %6 = vsyncpa [#allocation3], 0  ;;  %s166_s9 = smov [#allocation2]   ;;  %s167_s11 = smov 128   ;;  %s208_s0 = inlined_call_operand.hbm [shape: f32[2,16,16], index: 0, kind: input, shape index: {}]   ;;  %s209_s1 = inlined_call_operand.vmem [shape: f32[2,14,14], index: 1, kind: output, shape index: {}]  }
   0x1   :  { %s11_s8 = sshll.u32 %s208_s0, 4  ;;  %s13_s10 = sshll.u32 %s166_s9, 4  ;;  %s12_s8 = int_to_ptr.hbm [resolvable:$true] %s11_s8  ;;  %s14_s10 = int_to_ptr.vmem [resolvable:$true] %s13_s10 }
   0x2   :  { %s168_s12 = smov 8  }
   0x3   :  { %19 = dma.hbm_to_vmem [thread:$0]  %s12_s8, 512, %s14_s10, [#allocation3], %s167_s11, %s167_s11, %s168_s12  }
   0x4   :  { %164 = dma.done.wait [#allocation3], 512  }
   0x5   :  { %165 = vsyncadd [#allocation3], 4294966784  ;;  %v27_v0 = vld [vmem:[#allocation2 + $0x18] sm:$0xff]  ;;  %v25_v1 = vld [vmem:[#allocation2 + $0x8] sm:$0xff]  ;;  %vm47_vm0 = vcmask 1046528   ;;  %s169_s13 = smov 1  }
   0x6   :  { %v52_v2 = vrot.slane %v27_v0, 1  ;;  %v49_v3 = vrot.slane %v25_v1, 1  ;;  %v26_v4 = vld [vmem:[#allocation2 + $0x10] sm:$0xff]  ;;  %v24_v5 = vld [vmem:[#allocation2] sm:$0xff]  ;;  %s170_s0 = smov 127   ;;  %v34_v11 = vrot.slane %v25_v1, 2 }
   0x7   :  { %v48_v6 = vrot.slane %v24_v5, 1  ;;  %v51_v7 = vrot.slane %v26_v4, 1  ;;  %v87_v13 = vmul.f32 4.0, %v25_v1  ;;  %v33_v14 = vrot.slane %v24_v5, 2 }
   0x8   :  { %60 = vrot.lane.b32.xlu1 %v52_v2, %s169_s13  ;;  %56 = vrot.lane.b32.xlu0 %v49_v3, %s169_s13  ;;  %v44_v12 = vadd.f32 %v34_v11, %v25_v1  ;;  %vm32_vm1 = vcmask 1045504   ;;  %v36_v20 = vrot.slane %v26_v4, 2  ;;  %v86_v22 = vmul.f32 4.0, %v24_v5 }
   0x9   :  { %v50_v8 = vsel %vm47_vm0, %v48_v6, %v49_v3  ;;  %v53_v9 = vsel %vm47_vm0, %v51_v7, %v52_v2  ;;  %v95_v19 = vrot.slane %v87_v13, 1  ;;  %v35_v21 = vsel %vm32_vm1, %v33_v14, %v34_v11 }
   0xa   :  { %70 = vrot.lane.b32.xlu2 %v50_v8, %s170_s0  ;;  %v37_v24 = vrot.slane %v27_v0, 2  ;;  %v43_v26 = vadd.f32 %v35_v21, %v24_v5  ;;  %v94_v28 = vrot.slane %v86_v22, 1  ;;  %v89_v31 = vmul.f32 4.0, %v27_v0 }
   0xb   :  { %v88_v32 = vmul.f32 4.0, %v26_v4  ;;  %vm124_vm2 = vcmask 113664   ;;  %vm126_vm3 = vcmask 111616  }
   0xc   :  { %v38_v27 = vsel %vm32_vm1, %v36_v20, %v37_v24  ;;  %v96_v35 = vsel %vm47_vm0, %v94_v28, %v95_v19  ;;  %v46_v36 = vadd.f32 %v37_v24, %v27_v0  ;;  %v98_v38 = vrot.slane %v89_v31, 1 }
   0xd   :  { %v45_v33 = vadd.f32 %v38_v27, %v26_v4  ;;  %v97_v39 = vrot.slane %v88_v32, 1 }
   0xf   :  { %v99_v44 = vsel %vm47_vm0, %v97_v39, %v98_v38 }
  0x10   :  { %58 = vrot.lane.b32.xlu1 %v53_v9, %s169_s13  ;;  %54 = vrot.lane.b32.xlu0 %v50_v8, %s169_s13 }
  0x12   :  { %72 = vrot.lane.b32.xlu2 %v49_v3, %s170_s0 }
  0x18   :  { %76 = vrot.lane.b32.xlu1 %v52_v2, %s170_s0  ;;  %74 = vrot.lane.b32.xlu0 %v53_v9, %s170_s0 }
  0x64   :  { %v71_v10 = vpop.permute.xlu2 %70 }
  0x6c   :  { %v73_v15 = vpop.permute.xlu2 %72 }
  0x7a   :  { %v61_v16 = vpop.permute.xlu1 %60  ;;  %v57_v17 = vpop.permute.xlu0 %56 }
  0x7b   :  { %v67_v18 = vadd.f32 %v57_v17, %v44_v12  ;;  %v69_v42 = vadd.f32 %v61_v16, %v46_v36 }
  0x7d   :  { %v83_v23 = vadd.f32 %v73_v15, %v67_v18 }
  0x7f   :  { %v105_v25 = vsub.f32 %v83_v23, %v95_v19 }
  0x81   :  { %114 = vrot.lane.b32.xlu0 %v105_v25, %s170_s0 }
  0x82   :  { %v59_v29 = vpop.permute.xlu1 %58  ;;  %v55_v30 = vpop.permute.xlu0 %54 }
  0x83   :  { %v66_v34 = vadd.f32 %v55_v30, %v43_v26  ;;  %v68_v40 = vadd.f32 %v59_v29, %v45_v33 }
  0x85   :  { %v82_v37 = vadd.f32 %v71_v10, %v66_v34 }
  0x87   :  { %v104_v41 = vsub.f32 %v82_v37, %v96_v35 }
  0x89   :  { %112 = vrot.lane.b32.xlu2 %v104_v41, %s170_s0 }
  0x8a   :  { %v77_v43 = vpop.permute.xlu1 %76  ;;  %v75_v45 = vpop.permute.xlu0 %74 }
  0x8b   :  { %v85_v46 = vadd.f32 %v77_v43, %v69_v42  ;;  %v84_v47 = vadd.f32 %v75_v45, %v68_v40 }
  0x8d   :  { %v106_v48 = vsub.f32 %v84_v47, %v99_v44  ;;  %v107_v49 = vsub.f32 %v85_v46, %v98_v38 }
  0x8f   :  { %116 = vrot.lane.b32.xlu1 %v106_v48, %s170_s0 }
  0x91   :  { %118 = vrot.lane.b32.xlu2 %v107_v49, %s170_s0 }
  0xe3   :  { %v113_v50 = vpop.permute.xlu2 %112 }
  0xe4   :  { %125 = vst.msk [vmem:[%s209_s1] sm:$0xff] %vm124_vm2, %v113_v50 }
  0xeb   :  { %v119_v51 = vpop.permute.xlu2 %118 }
  0xec   :  { %129 = vst.msk [vmem:[%s209_s1 + $0x18] sm:$0x3f] %vm126_vm3, %v119_v51 }
  0xf3   :  { %v115_v52 = vpop.permute.xlu0 %114 }
  0xf4   :  { %127 = vst.msk [vmem:[%s209_s1 + $0x8] sm:$0x3f] %vm126_vm3, %v115_v52 }
 0x101   :  { %v117_v53 = vpop.permute.xlu1 %116 }
 0x102   :  { %128 = vst.msk [vmem:[%s209_s1 + $0x10] sm:$0xff] %vm124_vm2, %v117_v53 }
 0x103   :  { %134 = vsyncpa [#allocation3], 1 }

</bundles_post_ra>
